<compile_context>
chip_gen: v7x
topology: tpu7x:2x2x1
jax: 0.10.0
libtpu: 0.0.40
codegen_flags: <defaults>
</compile_context>

<pallas_src>
import jax
import jax.numpy as jnp
from jax.experimental import pallas as pl
from jax.experimental.pallas import tpu as pltpu


_MAX_DMA_CHUNKS = 4                      # up to 4 overlapping HBM->HBM DMAs
_MIN_DMA_CHUNK_BYTES = 1 * 1024 * 1024   # don't split copies below ~1 MiB/chunk


def _make_dma_copy_kernel(chunk_bounds):
    """Build an HBM->HBM DMA copy kernel.

    chunk_bounds is either None (single whole-array DMA) or a static list of
    (start, size) pairs along the leading axis.  All chunk DMAs are started
    before any is waited on, so they overlap across DMA engines.
    """

    def kernel(x_hbm, o_hbm, sems):
        if chunk_bounds is None:
            copies = [pltpu.make_async_copy(x_hbm, o_hbm, sems.at[0])]
        else:
            copies = [
                pltpu.make_async_copy(
                    x_hbm.at[pl.ds(start, size)],
                    o_hbm.at[pl.ds(start, size)],
                    sems.at[idx],
                )
                for idx, (start, size) in enumerate(chunk_bounds)
            ]
        for cp in copies:
            cp.start()
        for cp in copies:
            cp.wait()

    return kernel


def _pallas_dma_identity_copy(x):
    """Materialized identity: direct HBM->HBM DMA copy (no VMEM bounce)."""
    if x.ndim == 0:
        # Degenerate scalar: hand the DMA a tiny 2-D view (free reshape).
        return _pallas_dma_identity_copy(x.reshape(1, 1)).reshape(())

    nbytes = x.size * jnp.dtype(x.dtype).itemsize
    lead = x.shape[0]

    # Chunk along the leading axis (layout-benign) only when it pays off:
    # at least ~1 MiB per chunk, at most _MAX_DMA_CHUNKS concurrent DMAs.
    n_chunks = int(max(1, min(_MAX_DMA_CHUNKS, lead, nbytes // _MIN_DMA_CHUNK_BYTES)))
    if n_chunks <= 1:
        chunk_bounds = None
        n_sems = 1
    else:
        base, rem = divmod(lead, n_chunks)
        chunk_bounds, start = [], 0
        for i in range(n_chunks):
            size = base + (1 if i < rem else 0)
            chunk_bounds.append((start, size))
            start += size
        n_sems = n_chunks

    return pl.pallas_call(
        _make_dma_copy_kernel(chunk_bounds),
        out_shape=jax.ShapeDtypeStruct(x.shape, x.dtype),
        in_specs=[pl.BlockSpec(memory_space=pl.ANY)],
        out_specs=pl.BlockSpec(memory_space=pl.ANY),
        scratch_shapes=[pltpu.SemaphoreType.DMA((n_sems,))],
        cost_estimate=pl.CostEstimate(
            flops=0, transcendentals=0, bytes_accessed=2 * nbytes),
    )(x)


def selective_load_forward(x, *, materialize=False):
    """forward(x) -> x.

    Default path elides all data movement entirely (the module's forward is
    the identity: no kernel, no HBM traffic).  Pass materialize=True only if
    the caller requires a fresh materialized HBM buffer; that path runs the
    direct HBM->HBM DMA copy above (no VMEM staging, no grid overhead, no
    pad/slice round-trip for ragged shapes).
    """
    if not materialize or x.size == 0:
        return x
    return _pallas_dma_identity_copy(x)


if __name__ == "__main__":
    key = jax.random.PRNGKey(0)

    # Small NCHW input consistent with a conv-style module: batch=2, channels=4, 16x16.
    x = jax.random.normal(key, (2, 4, 16, 16), dtype=jnp.float32)

    # Optimal identity path: no kernel, no HBM traffic.
    y_fast = selective_load_forward(x)
    assert y_fast.shape == x.shape and y_fast.dtype == x.dtype
    assert bool(jnp.all(y_fast == x))

    # Materialized copy: single whole-array HBM->HBM DMA.
    y = jax.block_until_ready(selective_load_forward(x, materialize=True))
    assert y.shape == x.shape and y.dtype == x.dtype
    assert bool(jnp.all(y == x))

    # Ragged element count + packed dtype: copied in its original shape, so no
    # pad + slice round-trip and no relayout reshape are emitted.
    x2 = jax.random.normal(jax.random.PRNGKey(0), (3, 5, 7, 11), dtype=jnp.bfloat16)
    y2 = jax.block_until_ready(selective_load_forward(x2, materialize=True))
    assert y2.shape == x2.shape and y2.dtype == x2.dtype
    assert bool(jnp.all(y2 == x2))

    # Larger input (4 MiB) to exercise the chunked / overlapping multi-DMA path.
    x3 = jax.random.normal(jax.random.PRNGKey(0), (4, 256, 1024), dtype=jnp.float32)
    y3 = jax.block_until_ready(selective_load_forward(x3, materialize=True))
    assert y3.shape == x3.shape and y3.dtype == x3.dtype
    assert bool(jnp.all(y3 == x3))

    print("KERNEL_OK")
</pallas_src>

<mosaic_0001>
module attributes {stable_mosaic.version = 11 : i64} {
  func.func @kernel(%arg0: memref<2x4x16x16xf32, #tpu.memory_space<any>>, %arg1: memref<2x4x16x16xf32, #tpu.memory_space<any>>, %arg2: memref<1x!tpu.dma_semaphore, #tpu.memory_space<semaphore_mem>>) attributes {dimension_semantics = [], scalar_prefetch = 0 : i64, scratch_operands = 1 : i64, tpu.core_type = #tpu.core_type<tc>} {
    %c0_i32 = arith.constant 0 : i32
    %0 = tpu.memref_slice %arg2[%c0_i32] : memref<1x!tpu.dma_semaphore, #tpu.memory_space<semaphore_mem>> -> memref<1x!tpu.dma_semaphore, #tpu.memory_space<semaphore_mem>>
    %1 = tpu.memref_squeeze %0 : memref<1x!tpu.dma_semaphore, #tpu.memory_space<semaphore_mem>> -> memref<!tpu.dma_semaphore, #tpu.memory_space<semaphore_mem>>
    tpu.enqueue_dma source(%arg0 : memref<2x4x16x16xf32, #tpu.memory_space<any>>) target(%arg1 : memref<2x4x16x16xf32, #tpu.memory_space<any>>) target_semaphore(%1 : memref<!tpu.dma_semaphore, #tpu.memory_space<semaphore_mem>>)
    %c0_i32_0 = arith.constant 0 : i32
    %2 = tpu.memref_slice %arg2[%c0_i32_0] : memref<1x!tpu.dma_semaphore, #tpu.memory_space<semaphore_mem>> -> memref<1x!tpu.dma_semaphore, #tpu.memory_space<semaphore_mem>>
    %3 = tpu.memref_squeeze %2 : memref<1x!tpu.dma_semaphore, #tpu.memory_space<semaphore_mem>> -> memref<!tpu.dma_semaphore, #tpu.memory_space<semaphore_mem>>
    tpu.wait_dma2 semaphore(%3 : memref<!tpu.dma_semaphore, #tpu.memory_space<semaphore_mem>>) src(%arg0 : memref<2x4x16x16xf32, #tpu.memory_space<any>>) dst(%arg1 : memref<2x4x16x16xf32, #tpu.memory_space<any>>)
    return
  }
}

</mosaic_0001>

<bundles_post_ra>
// kernel: tpu_custom_call.1
= control target key start
LH: loop header
LB: loop body
LE: loop exit
PB: predicated region body
PF: predicated region fallthrough
CT: control target
= control target key end

     0   :  { %s36_s6 = smov [#allocation2]   ;;  %s37_s7 = smov [#allocation3]   ;;  %s55_s0 = inlined_call_operand.hbm [shape: f32[2,4,16,16], index: 0, kind: input, shape index: {}]   ;;  %s56_s1 = inlined_call_operand.hbm [shape: f32[2,4,16,16], index: 1, kind: output, shape index: {}]  }
   0x1   :  { %s38_s8 = smov 0  }
   0x2   :  { %18 = dma.general %s55_s0, 2048, %s56_s1, %s36_s6, %s37_s7, [#allocation4], %s38_s8, 0  }
   0x3   :  { %34 = dma.done.wait [#allocation2], 2048 }
   0x4   :  { %35 = vsyncadd [#allocation2], 4294965248 }
   0x5   :  { %24 = vsyncmov [#allocation2] }
   0x8   :  { %s25_s13 = vpop.sfrf %24 }
   0x9   :  { %p30_p0 = scmp.ne.s32.totalorder %s25_s13, 0 }
   0xb   :  { %29 = shalt.err (%p30_p0)  }

</bundles_post_ra>
